<compile_context>
chip_gen: v7x
topology: tpu7x:2x2x1
jax: 0.10.0
libtpu: 0.0.40
codegen_flags: <defaults>
</compile_context>

<pallas_src>
import functools

import jax
import jax.numpy as jnp
from jax.experimental import pallas as pl
from jax.experimental.pallas import tpu as pltpu

# ----------------------------- model config --------------------------------
# Scaled-down synthetic upstream (real one: downsample_rate = 16000*20//1000
# = 320, D = 768/1024, L = 12/24).
# TODO(synk): real S3PRL upstream is a multi-layer strided CNN followed by a
# self-attention transformer; approximated here by a frame projection plus
# residual GELU MLP layers with the same Featurizer weighted-sum dataflow.
FRAME_SIZE = 32      # downsample_rate (samples per output frame)
HIDDEN_D = 128       # hidden feature size (Featurizer output_size)
NUM_LAYERS = 4       # encoder layers (so L+1 = 5 hidden states)


def _round_up(x, m):
    return ((x + m - 1) // m) * m


def _pick_row_tile(rows):
    """Largest row tile with <=~12.5% padding waste, keeping >=2 grid tiles
    when rows allow (so ("parallel",) actually shards the two v7x cores)."""
    rows16 = _round_up(max(rows, 1), 16)     # bf16 sublane tile = 16
    if rows16 <= 16:
        return rows16
    cap = min(1024, max(16, (rows16 // 2) // 16 * 16))
    best = 16
    for tm in (16, 32, 64, 128, 256, 512, 1024):
        if tm > cap:
            break
        padded = pl.cdiv(rows, tm) * tm
        if padded - rows <= max(rows // 8, 16):
            best = tm
    return best


def _bf16_elementwise_ok():
    """v6e/v7x have bf16 VPU/EUP; older generations (and CPU interpret) keep
    the elementwise GELU chain in f32."""
    try:
        kind = jax.devices()[0].device_kind.lower()
    except Exception:
        return False
    if "tpu" not in kind:
        return False
    for old in ("v2", "v3", "v4", "v5"):
        if old in kind:
            return False
    return True


# ------------------------------ Pallas kernel ------------------------------
def _s3prl_frontend_kernel(p_ref, frames_ref, w_in_ref, b_in_ref,
                           w_l_ref, b_l_ref, out_ref, acc_ref, *,
                           use_bf16_ew):
    # p_ref:      (L+1,) f32 SMEM   -- precomputed Featurizer softmax weights
    # frames_ref: (TM, FRAME_SIZE) bf16 -- waveform frames (row tile, K=32)
    # w_in_ref:   (FRAME_SIZE, D) bf16  -- frame projection (CNN stand-in)
    # b_in_ref:   (1, D) f32
    # w_l_ref:    (L, D, D) bf16    -- encoder MLP weights (VMEM resident)
    # b_l_ref:    (L, 1, D) f32
    # out_ref:    (TM, D) bf16      -- final weighted-sum output
    # acc_ref:    (TM, D) f32 VMEM scratch -- accumulator (f32 precision)

    # Hidden state 0: frame projection on the MXU (bf16 in, f32 accumulate).
    h = jnp.dot(frames_ref[...], w_in_ref[...],
                preferred_element_type=jnp.float32) + b_in_ref[...]

    # Featurizer contribution of layer 0 (scalar from SMEM * f32 tile).
    acc_ref[...] = p_ref[0] * h

    # Encoder layers: residual GELU MLP; accumulate weighted hidden states
    # directly into the f32 VMEM scratch so only `h` + temporaries stay live.
    # TODO(synk): at real L=12..24 switch to lax.fori_loop with dynamic
    # w_l_ref[l] indexing to bound instruction footprint / live ranges.
    for l in range(NUM_LAYERS):
        z = jnp.dot(h.astype(jnp.bfloat16), w_l_ref[l],
                    preferred_element_type=jnp.float32) + b_l_ref[l]
        # Sigmoid-form GELU: 2 VALU muls + 1 EUP op (vs ~8-op tanh poly).
        if use_bf16_ew:
            zb = z.astype(jnp.bfloat16)
            g = (zb * jax.nn.sigmoid(1.702 * zb)).astype(jnp.float32)
        else:
            g = z * jax.nn.sigmoid(1.702 * z)
        h = h + g
        acc_ref[...] = acc_ref[...] + p_ref[l + 1] * h

    # Single bf16 store halves output HBM writeback (accumulation stayed f32).
    out_ref[...] = acc_ref[...].astype(out_ref.dtype)


# ------------------------------ wrapper -------------------------------------
def s3prl_frontend_forward(waveform, input_lengths, params,
                           out_dtype=jnp.bfloat16):
    """waveform: [B, S] f32, input_lengths: [B] int32 -> (feats, feats_lens)."""
    B, S = waveform.shape
    T = S // FRAME_SIZE
    D = HIDDEN_D
    L = NUM_LAYERS
    rows = B * T

    # Non-overlapping framing (frame_shift == frame_length).  Cast to bf16
    # BEFORE any padding; keep the frame (K) dim at FRAME_SIZE (no 32->128
    # zero pad in HBM -- last block dim == full array dim is legal).
    frames = waveform[:, :T * FRAME_SIZE].reshape(rows, FRAME_SIZE)
    frames = frames.astype(jnp.bfloat16)

    tm = _pick_row_tile(rows)
    num_tiles = pl.cdiv(rows, tm)
    padded_rows = num_tiles * tm
    if padded_rows != rows:
        # Padded rows compute garbage (sliced off below); tile selection
        # bounds this waste to ~12.5% of rows.
        frames = jnp.pad(frames, ((0, padded_rows - rows), (0, 0)))

    # MXU weights in bf16 (halves weight DMA bytes, native MXU dtype);
    # biases stay f32 (added after the f32 accumulate).
    w_in = params["w_in"].astype(jnp.bfloat16)           # (FRAME_SIZE, D)
    w_layers = params["w_layers"].astype(jnp.bfloat16)   # (L, D, D)
    b_in = params["b_in"]                                 # (1, D) f32
    b_layers = params["b_layers"]                         # (L, 1, D) f32

    # Featurizer softmax over the (L+1) layer weights, computed once in the
    # wrapper; passed to the kernel as SMEM scalars.
    p = jax.nn.softmax(params["layer_weights"].astype(jnp.float32))

    kernel = functools.partial(_s3prl_frontend_kernel,
                               use_bf16_ew=_bf16_elementwise_ok())

    # TODO(synk): at real scale (D=768/1024, L=12..24) the resident w_layers
    # (18-48 MiB bf16) must be streamed per layer (extra "arbitrary" grid
    # axis + h carried in scratch) on v7x's 64 MiB VMEM; keep it resident only
    # on v5e/v6e with vmem_limit_bytes raised accordingly.
    feats_flat = pl.pallas_call(
        kernel,
        out_shape=jax.ShapeDtypeStruct((padded_rows, D), out_dtype),
        grid=(num_tiles,),
        in_specs=[
            # (L+1,) softmax weights -> SMEM scalars, no blocking.
            pl.BlockSpec(memory_space=pltpu.MemorySpace.SMEM),
            # Row-tiled frames walk the grid axis (K kept at FRAME_SIZE).
            pl.BlockSpec((tm, FRAME_SIZE), lambda i: (i, 0)),
            # Weights/biases: constant block index -> VMEM resident.
            pl.BlockSpec((FRAME_SIZE, D), lambda i: (0, 0)),
            pl.BlockSpec((1, D), lambda i: (0, 0)),
            pl.BlockSpec((L, D, D), lambda i: (0, 0, 0)),
            pl.BlockSpec((L, 1, D), lambda i: (0, 0, 0)),
        ],
        out_specs=pl.BlockSpec((tm, D), lambda i: (i, 0)),
        scratch_shapes=[pltpu.VMEM((tm, D), jnp.float32)],
        compiler_params=pltpu.CompilerParams(
            dimension_semantics=("parallel",),   # shards row tiles across TCs
        ),
    )(p, frames, w_in, b_in, w_layers, b_layers)

    feats = feats_flat[:rows].reshape(B, T, D)
    feats_lens = (input_lengths // FRAME_SIZE).astype(jnp.int32)
    return feats, feats_lens


# ------------------------- pure-JAX reference (f32) -------------------------
def _reference_forward(waveform, input_lengths, params):
    B, S = waveform.shape
    T = S // FRAME_SIZE
    frames = waveform[:, :T * FRAME_SIZE].reshape(B * T, FRAME_SIZE)
    h = frames @ params["w_in"] + params["b_in"]
    p = jax.nn.softmax(params["layer_weights"].astype(jnp.float32))
    feats = p[0] * h
    for l in range(NUM_LAYERS):
        z = h @ params["w_layers"][l] + params["b_layers"][l]
        g = z * jax.nn.sigmoid(1.702 * z)
        h = h + g
        feats = feats + p[l + 1] * h
    feats = feats.reshape(B, T, HIDDEN_D)
    lens = (input_lengths // FRAME_SIZE).astype(jnp.int32)
    return feats, lens


def init_params(key):
    k0, k1, k2, k3, k4 = jax.random.split(key, 5)
    D, F, L = HIDDEN_D, FRAME_SIZE, NUM_LAYERS
    return {
        "w_in": 0.05 * jax.random.normal(k0, (F, D), jnp.float32),
        "b_in": 0.01 * jax.random.normal(k1, (1, D), jnp.float32),
        "w_layers": 0.05 * jax.random.normal(k2, (L, D, D), jnp.float32),
        "b_layers": 0.01 * jax.random.normal(k3, (L, 1, D), jnp.float32),
        # Featurizer weights over the L+1 hidden-state layers.
        "layer_weights": jax.random.normal(k4, (L + 1,), jnp.float32),
    }


if __name__ == "__main__":
    key = jax.random.PRNGKey(0)
    k_wav, k_par = jax.random.split(key)

    B = 2
    S = 256                                     # 8 frames of 32 samples
    waveform = jax.random.normal(k_wav, (B, S), jnp.float32)
    input_lengths = jnp.array([256, 200], dtype=jnp.int32)

    params = init_params(k_par)

    feats, feats_lens = s3prl_frontend_forward(waveform, input_lengths, params)
    jax.block_until_ready(feats)
    jax.block_until_ready(feats_lens)

    assert feats.shape == (B, S // FRAME_SIZE, HIDDEN_D)
    assert feats_lens.shape == (B,)

    # Correctness vs. f32 reference (bf16 MXU/elementwise/output tolerance).
    ref_feats, ref_lens = _reference_forward(waveform, input_lengths, params)
    assert jnp.allclose(feats.astype(jnp.float32), ref_feats,
                        rtol=1e-1, atol=1e-1)
    assert jnp.array_equal(feats_lens, ref_lens)

    print("KERNEL_OK")
</pallas_src>

<mosaic_0001>
module attributes {stable_mosaic.version = 11 : i64} {
  func.func @_s3prl_frontend_kernel(%arg0: i32, %arg1: memref<5xf32, #tpu.memory_space<smem>>, %arg2: memref<16x32xbf16, #tpu.memory_space<vmem>>, %arg3: memref<32x128xbf16, #tpu.memory_space<vmem>>, %arg4: memref<1x128xf32, #tpu.memory_space<vmem>>, %arg5: memref<4x128x128xbf16, #tpu.memory_space<vmem>>, %arg6: memref<4x1x128xf32, #tpu.memory_space<vmem>>, %arg7: memref<16x128xbf16, #tpu.memory_space<vmem>>, %arg8: memref<16x128xf32, #tpu.memory_space<vmem>>) attributes {dimension_semantics = [#tpu.dimension_semantics<parallel>], iteration_bounds = array<i64: 1>, scalar_prefetch = 0 : i64, scratch_operands = 1 : i64, tpu.core_type = #tpu.core_type<tc>, window_params = [{transform_indices = @transform_0, window_bounds = array<i64: 5>}, {transform_indices = @transform_1, window_bounds = array<i64: 16, 32>}, {pipeline_mode = #tpu.pipeline_mode<synchronous>, transform_indices = @transform_2, window_bounds = array<i64: 32, 128>}, {pipeline_mode = #tpu.pipeline_mode<synchronous>, transform_indices = @transform_3, window_bounds = array<i64: 1, 128>}, {pipeline_mode = #tpu.pipeline_mode<synchronous>, transform_indices = @transform_4, window_bounds = array<i64: 4, 128, 128>}, {pipeline_mode = #tpu.pipeline_mode<synchronous>, transform_indices = @transform_5, window_bounds = array<i64: 4, 1, 128>}, {transform_indices = @transform_6, window_bounds = array<i64: 16, 128>}]} {
    %c0 = arith.constant 0 : index
    %c0_0 = arith.constant 0 : index
    %0 = vector.load %arg2[%c0, %c0_0] : memref<16x32xbf16, #tpu.memory_space<vmem>>, vector<16x32xbf16>
    %c0_1 = arith.constant 0 : index
    %c0_2 = arith.constant 0 : index
    %1 = vector.load %arg3[%c0_1, %c0_2] : memref<32x128xbf16, #tpu.memory_space<vmem>>, vector<32x128xbf16>
    %cst = arith.constant dense<0.000000e+00> : vector<16x128xf32>
    %2 = tpu.matmul %0, %1, %cst {dimension_numbers = #tpu.dot_dimension_numbers<[1], [0], [0], [1], [0, 0, 1, 1], [], []>} : vector<16x32xbf16>, vector<32x128xbf16>, vector<16x128xf32> -> vector<16x128xf32>
    %c0_3 = arith.constant 0 : index
    %c0_4 = arith.constant 0 : index
    %3 = vector.load %arg4[%c0_3, %c0_4] : memref<1x128xf32, #tpu.memory_space<vmem>>, vector<1x128xf32>
    %4 = vector.broadcast %3 : vector<1x128xf32> to vector<16x128xf32>
    %5 = arith.addf %2, %4 : vector<16x128xf32>
    %c0_5 = arith.constant 0 : index
    %6 = memref.load %arg1[%c0_5] : memref<5xf32, #tpu.memory_space<smem>>
    %7 = vector.broadcast %6 : f32 to vector<16x128xf32>
    %8 = arith.mulf %7, %5 : vector<16x128xf32>
    %c0_6 = arith.constant 0 : index
    %c0_7 = arith.constant 0 : index
    %9 = vector.load %arg8[%c0_6, %c0_7] : memref<16x128xf32, #tpu.memory_space<vmem>>, vector<16x128xf32>
    tpu.vector_store %arg8[%c0_6, %c0_7], %8 {strides = array<i32>} : memref<16x128xf32, #tpu.memory_space<vmem>>, vector<16x128xf32>,
    %10 = arith.truncf %5 : vector<16x128xf32> to vector<16x128xbf16>
    %c0_8 = arith.constant 0 : index
    %c0_9 = arith.constant 0 : index
    %c0_10 = arith.constant 0 : index
    %11 = vector.load %arg5[%c0_8, %c0_9, %c0_10] : memref<4x128x128xbf16, #tpu.memory_space<vmem>>, vector<1x128x128xbf16>
    %12 = vector.shape_cast %11 : vector<1x128x128xbf16> to vector<128x128xbf16>
    %cst_11 = arith.constant dense<0.000000e+00> : vector<16x128xf32>
    %13 = tpu.matmul %10, %12, %cst_11 {dimension_numbers = #tpu.dot_dimension_numbers<[1], [0], [0], [1], [0, 0, 1, 1], [], []>} : vector<16x128xbf16>, vector<128x128xbf16>, vector<16x128xf32> -> vector<16x128xf32>
    %c0_12 = arith.constant 0 : index
    %c0_13 = arith.constant 0 : index
    %c0_14 = arith.constant 0 : index
    %14 = vector.load %arg6[%c0_12, %c0_13, %c0_14] : memref<4x1x128xf32, #tpu.memory_space<vmem>>, vector<1x1x128xf32>
    %15 = vector.shape_cast %14 : vector<1x1x128xf32> to vector<1x128xf32>
    %16 = vector.broadcast %15 : vector<1x128xf32> to vector<16x128xf32>
    %17 = arith.addf %13, %16 : vector<16x128xf32>
    %cst_15 = arith.constant 1.702000e+00 : f32
    %18 = vector.broadcast %cst_15 : f32 to vector<16x128xf32>
    %19 = arith.mulf %18, %17 : vector<16x128xf32>
    %20 = arith.negf %19 : vector<16x128xf32>
    %21 = math.exp %20 : vector<16x128xf32>
    %cst_16 = arith.constant 1.000000e+00 : f32
    %22 = vector.broadcast %cst_16 : f32 to vector<16x128xf32>
    %23 = arith.addf %22, %21 : vector<16x128xf32>
    %24 = arith.divf %22, %23 : vector<16x128xf32>
    %25 = arith.mulf %17, %24 : vector<16x128xf32>
    %26 = arith.addf %5, %25 : vector<16x128xf32>
    %c0_17 = arith.constant 0 : index
    %c0_18 = arith.constant 0 : index
    %27 = vector.load %arg8[%c0_17, %c0_18] : memref<16x128xf32, #tpu.memory_space<vmem>>, vector<16x128xf32>
    %c1 = arith.constant 1 : index
    %28 = memref.load %arg1[%c1] : memref<5xf32, #tpu.memory_space<smem>>
    %29 = vector.broadcast %28 : f32 to vector<16x128xf32>
    %30 = arith.mulf %29, %26 : vector<16x128xf32>
    %31 = arith.addf %27, %30 : vector<16x128xf32>
    %c0_19 = arith.constant 0 : index
    %c0_20 = arith.constant 0 : index
    %32 = vector.load %arg8[%c0_19, %c0_20] : memref<16x128xf32, #tpu.memory_space<vmem>>, vector<16x128xf32>
    tpu.vector_store %arg8[%c0_19, %c0_20], %31 {strides = array<i32>} : memref<16x128xf32, #tpu.memory_space<vmem>>, vector<16x128xf32>,
    %33 = arith.truncf %26 : vector<16x128xf32> to vector<16x128xbf16>
    %c1_21 = arith.constant 1 : index
    %c0_22 = arith.constant 0 : index
    %c0_23 = arith.constant 0 : index
    %34 = vector.load %arg5[%c1_21, %c0_22, %c0_23] : memref<4x128x128xbf16, #tpu.memory_space<vmem>>, vector<1x128x128xbf16>
    %35 = vector.shape_cast %34 : vector<1x128x128xbf16> to vector<128x128xbf16>
    %cst_24 = arith.constant dense<0.000000e+00> : vector<16x128xf32>
    %36 = tpu.matmul %33, %35, %cst_24 {dimension_numbers = #tpu.dot_dimension_numbers<[1], [0], [0], [1], [0, 0, 1, 1], [], []>} : vector<16x128xbf16>, vector<128x128xbf16>, vector<16x128xf32> -> vector<16x128xf32>
    %c1_25 = arith.constant 1 : index
    %c0_26 = arith.constant 0 : index
    %c0_27 = arith.constant 0 : index
    %37 = vector.load %arg6[%c1_25, %c0_26, %c0_27] : memref<4x1x128xf32, #tpu.memory_space<vmem>>, vector<1x1x128xf32>
    %38 = vector.shape_cast %37 : vector<1x1x128xf32> to vector<1x128xf32>
    %39 = vector.broadcast %38 : vector<1x128xf32> to vector<16x128xf32>
    %40 = arith.addf %36, %39 : vector<16x128xf32>
    %cst_28 = arith.constant 1.702000e+00 : f32
    %41 = vector.broadcast %cst_28 : f32 to vector<16x128xf32>
    %42 = arith.mulf %41, %40 : vector<16x128xf32>
    %43 = arith.negf %42 : vector<16x128xf32>
    %44 = math.exp %43 : vector<16x128xf32>
    %cst_29 = arith.constant 1.000000e+00 : f32
    %45 = vector.broadcast %cst_29 : f32 to vector<16x128xf32>
    %46 = arith.addf %45, %44 : vector<16x128xf32>
    %47 = arith.divf %45, %46 : vector<16x128xf32>
    %48 = arith.mulf %40, %47 : vector<16x128xf32>
    %49 = arith.addf %26, %48 : vector<16x128xf32>
    %c0_30 = arith.constant 0 : index
    %c0_31 = arith.constant 0 : index
    %50 = vector.load %arg8[%c0_30, %c0_31] : memref<16x128xf32, #tpu.memory_space<vmem>>, vector<16x128xf32>
    %c2 = arith.constant 2 : index
    %51 = memref.load %arg1[%c2] : memref<5xf32, #tpu.memory_space<smem>>
    %52 = vector.broadcast %51 : f32 to vector<16x128xf32>
    %53 = arith.mulf %52, %49 : vector<16x128xf32>
    %54 = arith.addf %50, %53 : vector<16x128xf32>
    %c0_32 = arith.constant 0 : index
    %c0_33 = arith.constant 0 : index
    %55 = vector.load %arg8[%c0_32, %c0_33] : memref<16x128xf32, #tpu.memory_space<vmem>>, vector<16x128xf32>
    tpu.vector_store %arg8[%c0_32, %c0_33], %54 {strides = array<i32>} : memref<16x128xf32, #tpu.memory_space<vmem>>, vector<16x128xf32>,
    %56 = arith.truncf %49 : vector<16x128xf32> to vector<16x128xbf16>
    %c2_34 = arith.constant 2 : index
    %c0_35 = arith.constant 0 : index
    %c0_36 = arith.constant 0 : index
    %57 = vector.load %arg5[%c2_34, %c0_35, %c0_36] : memref<4x128x128xbf16, #tpu.memory_space<vmem>>, vector<1x128x128xbf16>
    %58 = vector.shape_cast %57 : vector<1x128x128xbf16> to vector<128x128xbf16>
    %cst_37 = arith.constant dense<0.000000e+00> : vector<16x128xf32>
    %59 = tpu.matmul %56, %58, %cst_37 {dimension_numbers = #tpu.dot_dimension_numbers<[1], [0], [0], [1], [0, 0, 1, 1], [], []>} : vector<16x128xbf16>, vector<128x128xbf16>, vector<16x128xf32> -> vector<16x128xf32>
    %c2_38 = arith.constant 2 : index
    %c0_39 = arith.constant 0 : index
    %c0_40 = arith.constant 0 : index
    %60 = vector.load %arg6[%c2_38, %c0_39, %c0_40] : memref<4x1x128xf32, #tpu.memory_space<vmem>>, vector<1x1x128xf32>
    %61 = vector.shape_cast %60 : vector<1x1x128xf32> to vector<1x128xf32>
    %62 = vector.broadcast %61 : vector<1x128xf32> to vector<16x128xf32>
    %63 = arith.addf %59, %62 : vector<16x128xf32>
    %cst_41 = arith.constant 1.702000e+00 : f32
    %64 = vector.broadcast %cst_41 : f32 to vector<16x128xf32>
    %65 = arith.mulf %64, %63 : vector<16x128xf32>
    %66 = arith.negf %65 : vector<16x128xf32>
    %67 = math.exp %66 : vector<16x128xf32>
    %cst_42 = arith.constant 1.000000e+00 : f32
    %68 = vector.broadcast %cst_42 : f32 to vector<16x128xf32>
    %69 = arith.addf %68, %67 : vector<16x128xf32>
    %70 = arith.divf %68, %69 : vector<16x128xf32>
    %71 = arith.mulf %63, %70 : vector<16x128xf32>
    %72 = arith.addf %49, %71 : vector<16x128xf32>
    %c0_43 = arith.constant 0 : index
    %c0_44 = arith.constant 0 : index
    %73 = vector.load %arg8[%c0_43, %c0_44] : memref<16x128xf32, #tpu.memory_space<vmem>>, vector<16x128xf32>
    %c3 = arith.constant 3 : index
    %74 = memref.load %arg1[%c3] : memref<5xf32, #tpu.memory_space<smem>>
    %75 = vector.broadcast %74 : f32 to vector<16x128xf32>
    %76 = arith.mulf %75, %72 : vector<16x128xf32>
    %77 = arith.addf %73, %76 : vector<16x128xf32>
    %c0_45 = arith.constant 0 : index
    %c0_46 = arith.constant 0 : index
    %78 = vector.load %arg8[%c0_45, %c0_46] : memref<16x128xf32, #tpu.memory_space<vmem>>, vector<16x128xf32>
    tpu.vector_store %arg8[%c0_45, %c0_46], %77 {strides = array<i32>} : memref<16x128xf32, #tpu.memory_space<vmem>>, vector<16x128xf32>,
    %79 = arith.truncf %72 : vector<16x128xf32> to vector<16x128xbf16>
    %c3_47 = arith.constant 3 : index
    %c0_48 = arith.constant 0 : index
    %c0_49 = arith.constant 0 : index
    %80 = vector.load %arg5[%c3_47, %c0_48, %c0_49] : memref<4x128x128xbf16, #tpu.memory_space<vmem>>, vector<1x128x128xbf16>
    %81 = vector.shape_cast %80 : vector<1x128x128xbf16> to vector<128x128xbf16>
    %cst_50 = arith.constant dense<0.000000e+00> : vector<16x128xf32>
    %82 = tpu.matmul %79, %81, %cst_50 {dimension_numbers = #tpu.dot_dimension_numbers<[1], [0], [0], [1], [0, 0, 1, 1], [], []>} : vector<16x128xbf16>, vector<128x128xbf16>, vector<16x128xf32> -> vector<16x128xf32>
    %c3_51 = arith.constant 3 : index
    %c0_52 = arith.constant 0 : index
    %c0_53 = arith.constant 0 : index
    %83 = vector.load %arg6[%c3_51, %c0_52, %c0_53] : memref<4x1x128xf32, #tpu.memory_space<vmem>>, vector<1x1x128xf32>
    %84 = vector.shape_cast %83 : vector<1x1x128xf32> to vector<1x128xf32>
    %85 = vector.broadcast %84 : vector<1x128xf32> to vector<16x128xf32>
    %86 = arith.addf %82, %85 : vector<16x128xf32>
    %cst_54 = arith.constant 1.702000e+00 : f32
    %87 = vector.broadcast %cst_54 : f32 to vector<16x128xf32>
    %88 = arith.mulf %87, %86 : vector<16x128xf32>
    %89 = arith.negf %88 : vector<16x128xf32>
    %90 = math.exp %89 : vector<16x128xf32>
    %cst_55 = arith.constant 1.000000e+00 : f32
    %91 = vector.broadcast %cst_55 : f32 to vector<16x128xf32>
    %92 = arith.addf %91, %90 : vector<16x128xf32>
    %93 = arith.divf %91, %92 : vector<16x128xf32>
    %94 = arith.mulf %86, %93 : vector<16x128xf32>
    %95 = arith.addf %72, %94 : vector<16x128xf32>
    %c0_56 = arith.constant 0 : index
    %c0_57 = arith.constant 0 : index
    %96 = vector.load %arg8[%c0_56, %c0_57] : memref<16x128xf32, #tpu.memory_space<vmem>>, vector<16x128xf32>
    %c4 = arith.constant 4 : index
    %97 = memref.load %arg1[%c4] : memref<5xf32, #tpu.memory_space<smem>>
    %98 = vector.broadcast %97 : f32 to vector<16x128xf32>
    %99 = arith.mulf %98, %95 : vector<16x128xf32>
    %100 = arith.addf %96, %99 : vector<16x128xf32>
    %c0_58 = arith.constant 0 : index
    %c0_59 = arith.constant 0 : index
    %101 = vector.load %arg8[%c0_58, %c0_59] : memref<16x128xf32, #tpu.memory_space<vmem>>, vector<16x128xf32>
    tpu.vector_store %arg8[%c0_58, %c0_59], %100 {strides = array<i32>} : memref<16x128xf32, #tpu.memory_space<vmem>>, vector<16x128xf32>,
    %c0_60 = arith.constant 0 : index
    %c0_61 = arith.constant 0 : index
    %102 = vector.load %arg8[%c0_60, %c0_61] : memref<16x128xf32, #tpu.memory_space<vmem>>, vector<16x128xf32>
    %103 = arith.truncf %102 : vector<16x128xf32> to vector<16x128xbf16>
    %c0_62 = arith.constant 0 : index
    %c0_63 = arith.constant 0 : index
    %104 = vector.load %arg7[%c0_62, %c0_63] : memref<16x128xbf16, #tpu.memory_space<vmem>>, vector<16x128xbf16>
    tpu.vector_store %arg7[%c0_62, %c0_63], %103 {strides = array<i32>} : memref<16x128xbf16, #tpu.memory_space<vmem>>, vector<16x128xbf16>,
    return
  }
  func.func @transform_0(%arg0: i32) -> i32 {
    %c0_i32 = arith.constant 0 : i32
    %c0_i32_0 = arith.constant 0 : i32
    return %c0_i32 : i32
  }
  func.func @transform_1(%arg0: i32) -> (i32, i32) {
    %c0_i32 = arith.constant 0 : i32
    %c0_i32_0 = arith.constant 0 : i32
    return %arg0, %c0_i32 : i32, i32
  }
  func.func @transform_2(%arg0: i32) -> (i32, i32) {
    %c0_i32 = arith.constant 0 : i32
    %c0_i32_0 = arith.constant 0 : i32
    %c0_i32_1 = arith.constant 0 : i32
    return %c0_i32, %c0_i32_0 : i32, i32
  }
  func.func @transform_3(%arg0: i32) -> (i32, i32) {
    %c0_i32 = arith.constant 0 : i32
    %c0_i32_0 = arith.constant 0 : i32
    %c0_i32_1 = arith.constant 0 : i32
    return %c0_i32, %c0_i32_0 : i32, i32
  }
  func.func @transform_4(%arg0: i32) -> (i32, i32, i32) {
    %c0_i32 = arith.constant 0 : i32
    %c0_i32_0 = arith.constant 0 : i32
    %c0_i32_1 = arith.constant 0 : i32
    %c0_i32_2 = arith.constant 0 : i32
    return %c0_i32, %c0_i32_0, %c0_i32_1 : i32, i32, i32
  }
  func.func @transform_5(%arg0: i32) -> (i32, i32, i32) {
    %c0_i32 = arith.constant 0 : i32
    %c0_i32_0 = arith.constant 0 : i32
    %c0_i32_1 = arith.constant 0 : i32
    %c0_i32_2 = arith.constant 0 : i32
    return %c0_i32, %c0_i32_0, %c0_i32_1 : i32, i32, i32
  }
  func.func @transform_6(%arg0: i32) -> (i32, i32) {
    %c0_i32 = arith.constant 0 : i32
    %c0_i32_0 = arith.constant 0 : i32
    return %arg0, %c0_i32 : i32, i32
  }
}

</mosaic_0001>

<bundles_post_ra>
// kernel: tpu_custom_call.1
= control target key start
LH: loop header
LB: loop body
LE: loop exit
PB: predicated region body
PF: predicated region fallthrough
CT: control target
= control target key end

     0   :  { %11 = vsyncpa [#allocation6], 0  ;;  %s1338_s0 = inlined_call_operand.hbm [shape: f32[5], index: 0, kind: input, shape index: {}]   ;;  %s1339_s1 = inlined_call_operand.hbm [shape: bf16[16,32], index: 1, kind: input, shape index: {}]   ;;  %s1340_s2 = inlined_call_operand.hbm [shape: bf16[32,128], index: 2, kind: input, shape index: {}]   ;;  %s1341_s3 = inlined_call_operand.vmem [shape: f32[1,128], index: 3, kind: input, shape index: {}]   ;;  %s1342_s4 = inlined_call_operand.hbm [shape: bf16[4,128,128], index: 4, kind: input, shape index: {}]   ;;  %s1343_s5 = inlined_call_operand.vmem [shape: f32[4,1,128], index: 5, kind: input, shape index: {}]   ;;  %s1344_s6 = inlined_call_operand.hbm [shape: bf16[16,128], index: 6, kind: output, shape index: {}]  }
   0x1   :  { %12 = vsyncpa [#allocation4], 0 }
   0x2   :  { %13 = vsyncpa [#allocation9], 0 }
   0x3   :  { %14 = vsyncpa [#allocation5], 0  ;;  %s1133_s21 = smov [#allocation8]   ;;  %s1134_s23 = smov [#allocation7]  }
   0x4   :  { %s40_s22 = sshll.u32 %s1133_s21, 4  ;;  %s28_s24 = sshll.u32 %s1134_s23, 4  ;;  %s41_s22 = int_to_ptr.vmem [resolvable:$true] %s40_s22  ;;  %s29_s24 = int_to_ptr.vmem [resolvable:$true] %s28_s24 }
   0x5   :  { %s1027_s27 = scalar_lea.hbm %s1340_s2, 256 }
   0x6   :  { %p1028_p0 = scmp.ne.s32.totalorder %s1340_s2, %s1027_s27  ;;  %p1031_p1 = scmp.lt.u32.totalorder %s1027_s27, %s1340_s2 }
   0x8   :  { %p1033_p2 = pnand %p1031_p1, %p1028_p0 }
   0xa   :  { %1036 = shalt.err (!%p1033_p2)
}
   0xb   :  { %s1037_s8 = scalar_lea.vmem %s41_s22, 256  ;;  %p1042_p4 = scmp.lt.s32.totalorder %s41_s22, %s41_s22 }
   0xc   :  { %p1038_p3 = scmp.ne.s32.totalorder %s41_s22, %s1037_s8  ;;  %p1043_p5 = scmp.lt.s32.totalorder %s1037_s8, %s1037_s8 }
   0xe   :  { %p1044_p6 = por %p1043_p5, %p1042_p4 }
  0x10   :  { %p1045_p7 = pnand %p1044_p6, %p1038_p3 }
  0x12   :  { %1048 = shalt.err (!%p1045_p7)
}
  0x13   :  { %s1135_s9 = smov 64   ;;  %s1136_s10 = smov 4  }
  0x14   :  { %46 = dma.hbm_to_vmem [thread:$0]  %s1340_s2, 256, %s41_s22, [#allocation9], %s1135_s9, %s1135_s9, %s1136_s10  }
  0x15   :  { %s1049_s15 = scalar_lea.hbm %s1338_s0, 16 }
  0x16   :  { %p1050_p8 = scmp.ne.s32.totalorder %s1338_s0, %s1049_s15  ;;  %p1053_p9 = scmp.lt.u32.totalorder %s1049_s15, %s1338_s0 }
  0x18   :  { %p1055_p10 = pnand %p1053_p9, %p1050_p8 }
  0x1a   :  { %1058 = shalt.err (!%p1055_p10)
}
  0x1b   :  { %s1137_s20 = smov [#allocation3]   ;;  %s1059_s25 = scalar_lea.hbm %s1339_s1, 128 }
  0x1c   :  { %22 = dma.hbm_to_smem %s1338_s0, 16, %s1137_s20, [#allocation6]  }
  0x1d   :  { %p1060_p11 = scmp.ne.s32.totalorder %s1339_s1, %s1059_s25  ;;  %p1063_p12 = scmp.lt.u32.totalorder %s1059_s25, %s1339_s1 }
  0x1f   :  { %p1065_p13 = pnand %p1063_p12, %p1060_p11 }
  0x21   :  { %1068 = shalt.err (!%p1065_p13)
}
  0x22   :  { %s1069_s30 = scalar_lea.vmem %s29_s24, 128  ;;  %p1074_p1 = scmp.lt.s32.totalorder %s29_s24, %s29_s24 }
  0x23   :  { %p1070_p0 = scmp.ne.s32.totalorder %s29_s24, %s1069_s30  ;;  %p1075_p2 = scmp.lt.s32.totalorder %s1069_s30, %s1069_s30 }
  0x25   :  { %p1076_p3 = por %p1075_p2, %p1074_p1 }
  0x27   :  { %p1077_p4 = pnand %p1076_p3, %p1070_p0 }
  0x29   :  { %1080 = shalt.err (!%p1077_p4)
}
  0x2a   :  { %34 = dma.hbm_to_vmem [thread:$0]  %s1339_s1, 128, %s29_s24, [#allocation4], %s1135_s9, %s1135_s9, %s1136_s10  }
  0x2b   :  { %s1138_s8 = smov [#allocation10]   ;;  %s1081_s14 = scalar_lea.hbm %s1342_s4, 4096 }
  0x2c   :  { %s54_s11 = sshll.u32 %s1138_s8, 4  ;;  %p1082_p5 = scmp.ne.s32.totalorder %s1342_s4, %s1081_s14  ;;  %s55_s11 = int_to_ptr.vmem [resolvable:$true] %s54_s11 }
  0x2d   :  { %p1085_p6 = scmp.lt.u32.totalorder %s1081_s14, %s1342_s4 }
  0x2f   :  { %p1087_p7 = pnand %p1085_p6, %p1082_p5 }
  0x31   :  { %1090 = shalt.err (!%p1087_p7)
}
  0x32   :  { %s1091_s19 = scalar_lea.vmem %s55_s11, 4096  ;;  %p1096_p9 = scmp.lt.s32.totalorder %s55_s11, %s55_s11 }
  0x33   :  { %p1092_p8 = scmp.ne.s32.totalorder %s55_s11, %s1091_s19  ;;  %p1097_p10 = scmp.lt.s32.totalorder %s1091_s19, %s1091_s19 }
  0x35   :  { %p1098_p11 = por %p1097_p10, %p1096_p9 }
  0x37   :  { %p1099_p12 = pnand %p1098_p11, %p1092_p8 }
  0x39   :  { %1102 = shalt.err (!%p1099_p12)
}
  0x3a   :  { %60 = dma.hbm_to_vmem [thread:$0]  %s1342_s4, 4096, %s55_s11, [#allocation9], %s1135_s9, %s1135_s9, %s1136_s10  }
  0x3b   :  { %1125 = dma.done.wait [#allocation6], 16  }
  0x3c   :  { %1126 = vsyncadd [#allocation6], 4294967280 }
  0x3d   :  { %1127 = dma.done.wait [#allocation4], 128  }
  0x3e   :  { %1128 = vsyncadd [#allocation4], 4294967168 }
  0x3f   :  { %1129 = dma.done.wait [#allocation9], 4352  }
  0x40   :  { %1130 = vsyncadd [#allocation9], 4294962944 }
  0x41   :  { %75 = sfence }
  0x42   :  { %v960_v0 = vld [vmem:[#allocation8] sm:$0xff]   ;;  %v1139_v1 = vmov 0.0   ;;  %v961_v2 = vld [vmem:[#allocation8 + $0x8] sm:$0xff]   ;;  %vm1140_vm0 = vmmov 0   ;;  %v963_v3 = vld [vmem:[#allocation10] sm:$0xff]   ;;  %vm107_vm1 = vcmask 261120  }
  0x43   :  { %863 = vmatprep.subr.bf16.mxu0 %v1139_v1  ;;  %871 = vmatprep.subr.bf16.mxu1 %v1139_v1  ;;  %v962_v4 = vld [vmem:[#allocation7] sm:$0xff]   ;;  %v965_v6 = vld [vmem:[#allocation10 + $0x10] sm:$0xff]   ;;  %v966_v7 = vld [vmem:[#allocation10 + $0x18] sm:$0xff]   ;;  %s775_s28 = sld [smem:[#allocation3 + $0x1]]  ;;  %s152_s29 = sld [smem:[#allocation3]] }
  0x44   :  { %864 = vmatpush3.bf16.msra.mxu0 %v960_v0  ;;  %867 = vmatprep.mubr.msk.bf16.mxu0 %vm1140_vm0, %v1139_v1  ;;  %v964_v5 = vld [vmem:[#allocation10 + $0x8] sm:$0xff]   ;;  %v967_v8 = vld [vmem:[#allocation10 + $0x20] sm:$0xff]   ;;  %v969_v10 = vld [vmem:[#allocation10 + $0x30] sm:$0xff]   ;;  %s801_s30 = sld [smem:[#allocation3 + $0x3]]  ;;  %s814_s0 = sld [smem:[#allocation3 + $0x4]] }
  0x45   :  { %865 = vmatprep.subr.bf16.mxu0 %v1139_v1  ;;  %887 = vmatprep.mubr.msk.bf16.mxu1 %vm1140_vm0, %v1139_v1  ;;  %v968_v9 = vld [vmem:[#allocation10 + $0x28] sm:$0xff]   ;;  %v970_v11 = vld [vmem:[#allocation10 + $0x38] sm:$0xff]   ;;  %v759_v12 = vld [vmem:[%s1341_s3] ss:$0 sm:$0xff]  ;;  %s1141_s7 = smov [#allocation11]  }
  0x46   :  { %872 = vmatpush3.bf16.msra.mxu1 %v963_v3  ;;  %v971_v20 = vld [vmem:[#allocation10 + $0x40] sm:$0xff]   ;;  %v972_v21 = vld [vmem:[#allocation10 + $0x48] sm:$0xff]   ;;  %v973_v22 = vld [vmem:[#allocation10 + $0x50] sm:$0xff]   ;;  %s745_s8 = sshll.u32 %s1141_s7, 4  ;;  %s746_s8 = int_to_ptr.vmem [resolvable:$true] %s745_s8 }
  0x47   :  { %873 = vmatprep.subr.bf16.mxu1 %v1139_v1  ;;  %v974_v23 = vld [vmem:[#allocation10 + $0x58] sm:$0xff]   ;;  %v975_v24 = vld [vmem:[#allocation10 + $0x60] sm:$0xff]   ;;  %v976_v25 = vld [vmem:[#allocation10 + $0x68] sm:$0xff]   ;;  %s1103_s11 = scalar_lea.vmem %s746_s8, 128  ;;  %p1108_p0 = scmp.lt.s32.totalorder %s746_s8, %s746_s8 }
  0x48   :  { %866 = vmatpush3.bf16.msra.mxu0 %v961_v2  ;;  %v977_v26 = vld [vmem:[#allocation10 + $0x70] sm:$0xff]   ;;  %v978_v27 = vld [vmem:[#allocation10 + $0x78] sm:$0xff]   ;;  %v764_v28 = vld [vmem:[%s1343_s5] ss:$0 sm:$0xff]  ;;  %p1104_p13 = scmp.ne.s32.totalorder %s746_s8, %s1103_s11  ;;  %p1109_p1 = scmp.lt.s32.totalorder %s1103_s11, %s1103_s11 }
  0x49   :  { %891 = vmatprep.subr.bf16.mxu0 %v1139_v1  ;;  %v979_v50 = vld [vmem:[#allocation10 + $0x80] sm:$0xff]   ;;  %v980_v51 = vld [vmem:[#allocation10 + $0x88] sm:$0xff]   ;;  %v981_v52 = vld [vmem:[#allocation10 + $0x90] sm:$0xff]  }
  0x4a   :  { %874 = vmatpush3.bf16.msra.mxu1 %v964_v5  ;;  %v982_v53 = vld [vmem:[#allocation10 + $0x98] sm:$0xff]   ;;  %v983_v54 = vld [vmem:[#allocation10 + $0xa0] sm:$0xff]   ;;  %v984_v55 = vld [vmem:[#allocation10 + $0xa8] sm:$0xff]   ;;  %p1110_p2 = por %p1109_p1, %p1108_p0 }
  0x4b   :  { %868 = vmatmul.mubr.msk.bf16.vlgmr.msra.gmra.mrb[0].mxu0 %vm107_vm1, %v962_v4  ;;  %875 = vmatprep.subr.bf16.mxu1 %v1139_v1  ;;  %v985_v56 = vld [vmem:[#allocation10 + $0xb0] sm:$0xff]   ;;  %v986_v57 = vld [vmem:[#allocation10 + $0xb8] sm:$0xff]   ;;  %v777_v58 = vld [vmem:[%s1343_s5 + $0x1] ss:$0 sm:$0xff] }
  0x4c   :  { %907 = vmatprep.mubr.msk.bf16.mxu0 %vm1140_vm0, %v1139_v1  ;;  %892 = vmatpush3.bf16.msra.mxu0 %v971_v20  ;;  %v988_v20 = vld [vmem:[#allocation10 + $0xc8] sm:$0xff]   ;;  %p1111_p3 = pnand %p1110_p2, %p1104_p13 }
  0x4d   :  { %893 = vmatprep.subr.bf16.mxu0 %v1139_v1 }
  0x4e   :  { %876 = vmatpush3.bf16.msra.mxu1 %v965_v6 }
  0x4f   :  { %877 = vmatprep.subr.bf16.mxu1 %v1139_v1 }
  0x50   :  { %894 = vmatpush3.bf16.msra.mxu0 %v972_v21  ;;  %v989_v21 = vld [vmem:[#allocation10 + $0xd0] sm:$0xff]  }
  0x51   :  { %895 = vmatprep.subr.bf16.mxu0 %v1139_v1 }
  0x52   :  { %878 = vmatpush3.bf16.msra.mxu1 %v966_v7 }
  0x53   :  { %879 = vmatprep.subr.bf16.mxu1 %v1139_v1 }
  0x54   :  { %896 = vmatpush3.bf16.msra.mxu0 %v973_v22  ;;  %v990_v22 = vld [vmem:[#allocation10 + $0xd8] sm:$0xff]  }
  0x55   :  { %897 = vmatprep.subr.bf16.mxu0 %v1139_v1 }
  0x56   :  { %880 = vmatpush3.bf16.msra.mxu1 %v967_v8 }
  0x57   :  { %881 = vmatprep.subr.bf16.mxu1 %v1139_v1 }
  0x58   :  { %898 = vmatpush3.bf16.msra.mxu0 %v974_v23  ;;  %v991_v23 = vld [vmem:[#allocation10 + $0xe0] sm:$0xff]  }
  0x59   :  { %899 = vmatprep.subr.bf16.mxu0 %v1139_v1 }
  0x5a   :  { %882 = vmatpush3.bf16.msra.mxu1 %v968_v9 }
  0x5b   :  { %883 = vmatprep.subr.bf16.mxu1 %v1139_v1 }
  0x5c   :  { %900 = vmatpush3.bf16.msra.mxu0 %v975_v24  ;;  %v992_v24 = vld [vmem:[#allocation10 + $0xe8] sm:$0xff]  }
  0x5d   :  { %901 = vmatprep.subr.bf16.mxu0 %v1139_v1 }
  0x5e   :  { %884 = vmatpush3.bf16.msra.mxu1 %v969_v10 }
  0x5f   :  { %885 = vmatprep.subr.bf16.mxu1 %v1139_v1 }
  0x60   :  { %902 = vmatpush3.bf16.msra.mxu0 %v976_v25  ;;  %v993_v25 = vld [vmem:[#allocation10 + $0xf0] sm:$0xff]  }
  0x61   :  { %903 = vmatprep.subr.bf16.mxu0 %v1139_v1 }
  0x62   :  { %886 = vmatpush3.bf16.msra.mxu1 %v970_v11 }
  0x63   :  { %911 = vmatprep.subr.bf16.mxu1 %v1139_v1 }
  0x64   :  { %904 = vmatpush3.bf16.msra.mxu0 %v977_v26  ;;  %v994_v26 = vld [vmem:[#allocation10 + $0xf8] sm:$0xff]  }
  0x65   :  { %905 = vmatprep.subr.bf16.mxu0 %v1139_v1 }
  0x68   :  { %906 = vmatpush3.bf16.msra.mxu0 %v978_v27  ;;  %v790_v27 = vld [vmem:[%s1343_s5 + $0x2] ss:$0 sm:$0xff] }
  0x69   :  { %931 = vmatprep.subr.bf16.mxu0 %v1139_v1 }
 0x11e   :  { %v145_v13 = vpop.f32.mrb[0].mxu0 }
 0x11f   :  { %v869_v14 = vpop.f32.mrb[1].mxu0  ;;  %v1255_v16 = vadd.f32 %v759_v12, %v145_v13 }
 0x120   :  { %v148_v15 = vpop.f32.mrb[2].mxu0 }
 0x121   :  { %v1257_v17 = vadd.f32 %v759_v12, %v148_v15  ;;  %v870_v18 = vpop.f32.mrb[3].mxu0 }
 0x123   :  { %v158_v19 = vpack.c.bf16 %v1257_v17, %v1255_v16 }
 0x125   :  { %888 = vmatmul.mubr.bf16.vlgmr.msra.gmra.mrb[0].mxu1 %v158_v19  ;;  %v987_v19 = vld [vmem:[#allocation10 + $0xc0] sm:$0xff]  }
 0x126   :  { %927 = vmatprep.mubr.msk.bf16.mxu1 %vm1140_vm0, %v1139_v1  ;;  %912 = vmatpush3.bf16.msra.mxu1 %v979_v50  ;;  %v803_v50 = vld [vmem:[%s1343_s5 + $0x3] ss:$0 sm:$0xff]  ;;  %s788_s5 = sld [smem:[#allocation3 + $0x2]] }
 0x127   :  { %913 = vmatprep.subr.bf16.mxu1 %v1139_v1 }
 0x12a   :  { %914 = vmatpush3.bf16.msra.mxu1 %v980_v51 }
 0x12b   :  { %915 = vmatprep.subr.bf16.mxu1 %v1139_v1 }
 0x12e   :  { %916 = vmatpush3.bf16.msra.mxu1 %v981_v52 }
 0x12f   :  { %917 = vmatprep.subr.bf16.mxu1 %v1139_v1 }
 0x132   :  { %918 = vmatpush3.bf16.msra.mxu1 %v982_v53 }
 0x133   :  { %919 = vmatprep.subr.bf16.mxu1 %v1139_v1 }
 0x136   :  { %920 = vmatpush3.bf16.msra.mxu1 %v983_v54 }
 0x137   :  { %921 = vmatprep.subr.bf16.mxu1 %v1139_v1 }
 0x13a   :  { %922 = vmatpush3.bf16.msra.mxu1 %v984_v55 }
 0x13b   :  { %923 = vmatprep.subr.bf16.mxu1 %v1139_v1 }
 0x13e   :  { %924 = vmatpush3.bf16.msra.mxu1 %v985_v56 }
 0x13f   :  { %925 = vmatprep.subr.bf16.mxu1 %v1139_v1 }
 0x142   :  { %926 = vmatpush3.bf16.msra.mxu1 %v986_v57 }
 0x1f8   :  { %v264_v29 = vpop.f32.mrb[0].mxu1 }
 0x1f9   :  { %v265_v30 = vadd.f32 %v764_v28, %v264_v29  ;;  %v889_v31 = vpop.f32.mrb[1].mxu1 }
 0x1fa   :  { %v267_v32 = vpop.f32.mrb[2].mxu1 }
 0x1fb   :  { %v773_v33 = vmul.f32 -1.702, %v265_v30  ;;  %v268_v34 = vadd.f32 %v764_v28, %v267_v32  ;;  %v890_v35 = vpop.f32.mrb[3].mxu1 }
 0x1fd   :  { %v275_v36 = vmul.f32 1.442695, %v773_v33  ;;  %v774_v37 = vmul.f32 -1.702, %v268_v34 }
 0x1ff   :  { %995 = vpow2.f32 %v275_v36  ;;  %v277_v38 = vmul.f32 1.442695, %v774_v37 }
 0x201   :  { %997 = vpow2.f32 %v277_v38 }
 0x209   :  { %v996_v39 = vpop.eup %995 }
 0x20a   :  { %v279_v40 = vadd.f32 1.0, %v996_v39 }
 0x20b   :  { %v998_v41 = vpop.eup %997 }
 0x20c   :  { %999 = vrcp.f32 %v279_v40  ;;  %v280_v42 = vadd.f32 1.0, %v998_v41 }
 0x20e   :  { %1001 = vrcp.f32 %v280_v42 }
 0x216   :  { %v1000_v43 = vpop.eup %999 }
 0x217   :  { %v285_v44 = vmul.f32 %v1000_v43, %v265_v30 }
 0x218   :  { %v1002_v45 = vpop.eup %1001 }
 0x219   :  { %v286_v46 = vmul.f32 %v1002_v45, %v268_v34  ;;  %v1275_v47 = vadd.f32 %v285_v44, %v1255_v16 }
 0x21b   :  { %v1278_v48 = vadd.f32 %v286_v46, %v1257_v17 }
 0x21d   :  { %v299_v49 = vpack.c.bf16 %v1278_v48, %v1275_v47 }
 0x21f   :  { %908 = vmatmul.mubr.bf16.vlgmr.msra.gmra.mrb[4].mxu0 %v299_v49 }
 0x220   :  { %947 = vmatprep.mubr.msk.bf16.mxu0 %vm1140_vm0, %v1139_v1  ;;  %932 = vmatpush3.bf16.msra.mxu0 %v987_v19 }
 0x221   :  { %933 = vmatprep.subr.bf16.mxu0 %v1139_v1 }
 0x224   :  { %934 = vmatpush3.bf16.msra.mxu0 %v988_v20 }
 0x225   :  { %935 = vmatprep.subr.bf16.mxu0 %v1139_v1 }
 0x228   :  { %936 = vmatpush3.bf16.msra.mxu0 %v989_v21  ;;  %v721_v21 = vstv %s814_s0 }
 0x229   :  { %937 = vmatprep.subr.bf16.mxu0 %v1139_v1 }
 0x22c   :  { %938 = vmatpush3.bf16.msra.mxu0 %v990_v22 }
 0x22d   :  { %939 = vmatprep.subr.bf16.mxu0 %v1139_v1 }
 0x230   :  { %940 = vmatpush3.bf16.msra.mxu0 %v991_v23 }
 0x231   :  { %941 = vmatprep.subr.bf16.mxu0 %v1139_v1 }
 0x234   :  { %942 = vmatpush3.bf16.msra.mxu0 %v992_v24 }
 0x235   :  { %943 = vmatprep.subr.bf16.mxu0 %v1139_v1 }
 0x238   :  { %944 = vmatpush3.bf16.msra.mxu0 %v993_v25 }
 0x239   :  { %945 = vmatprep.subr.bf16.mxu0 %v1139_v1 }
 0x23c   :  { %946 = vmatpush3.bf16.msra.mxu0 %v994_v26 }
 0x2f2   :  { %v407_v59 = vpop.f32.mrb[4].mxu0 }
 0x2f3   :  { %v408_v60 = vadd.f32 %v777_v58, %v407_v59  ;;  %v909_v61 = vpop.f32.mrb[5].mxu0 }
 0x2f4   :  { %v410_v62 = vpop.f32.mrb[6].mxu0 }
 0x2f5   :  { %v786_v63 = vmul.f32 -1.702, %v408_v60  ;;  %v411_v0 = vadd.f32 %v777_v58, %v410_v62  ;;  %v910_v2 = vpop.f32.mrb[7].mxu0 }
 0x2f6   :  { %v292_v2 = vstv %s775_s28 }
 0x2f7   :  { %v418_v3 = vmul.f32 1.442695, %v786_v63  ;;  %v787_v4 = vmul.f32 -1.702, %v411_v0 }
 0x2f9   :  { %1003 = vpow2.f32 %v418_v3  ;;  %v420_v5 = vmul.f32 1.442695, %v787_v4  ;;  %v153_v3 = vstv %s152_s29  ;;  %v293_v4 = vmul.f32 %v292_v2, %v1275_v47 }
 0x2fb   :  { %1005 = vpow2.f32 %v420_v5  ;;  %v294_v5 = vmul.f32 %v292_v2, %v1278_v48 }
 0x303   :  { %v1004_v6 = vpop.eup %1003 }
 0x304   :  { %v422_v7 = vadd.f32 1.0, %v1004_v6  ;;  %v435_v6 = vstv %s788_s5 }
 0x305   :  { %v1006_v8 = vpop.eup %1005 }
 0x306   :  { %1007 = vrcp.f32 %v422_v7  ;;  %v423_v9 = vadd.f32 1.0, %v1006_v8  ;;  %v154_v8 = vmul.f32 %v153_v3, %v1255_v16 }
 0x308   :  { %1009 = vrcp.f32 %v423_v9  ;;  %v155_v9 = vmul.f32 %v153_v3, %v1257_v17  ;;  %v295_v19 = vadd.f32 %v293_v4, %v154_v8 }
 0x30a   :  { %v296_v20 = vadd.f32 %v294_v5, %v155_v9 }
 0x310   :  { %v1008_v10 = vpop.eup %1007 }
 0x311   :  { %v428_v11 = vmul.f32 %v1008_v10, %v408_v60  ;;  %v578_v10 = vstv %s801_s30 }
 0x312   :  { %v1010_v12 = vpop.eup %1009 }
 0x313   :  { %v429_v13 = vmul.f32 %v1010_v12, %v411_v0  ;;  %v1295_v14 = vadd.f32 %v428_v11, %v1275_v47 }
 0x315   :  { %v1298_v15 = vadd.f32 %v429_v13, %v1278_v48  ;;  %v436_v12 = vmul.f32 %v435_v6, %v1295_v14 }
 0x317   :  { %v442_v18 = vpack.c.bf16 %v1298_v15, %v1295_v14  ;;  %v437_v13 = vmul.f32 %v435_v6, %v1298_v15  ;;  %v438_v25 = vadd.f32 %v436_v12, %v295_v19 }
 0x319   :  { %928 = vmatmul.mubr.bf16.vlgmr.msra.gmra.mrb[4].mxu1 %v442_v18  ;;  %v439_v26 = vadd.f32 %v437_v13, %v296_v20 }
 0x3ec   :  { %v550_v28 = vpop.f32.mrb[4].mxu1 }
 0x3ed   :  { %v551_v29 = vadd.f32 %v790_v27, %v550_v28  ;;  %v929_v30 = vpop.f32.mrb[5].mxu1 }
 0x3ee   :  { %v553_v31 = vpop.f32.mrb[6].mxu1 }
 0x3ef   :  { %v799_v32 = vmul.f32 -1.702, %v551_v29  ;;  %v554_v33 = vadd.f32 %v790_v27, %v553_v31  ;;  %v930_v34 = vpop.f32.mrb[7].mxu1 }
 0x3f1   :  { %v561_v35 = vmul.f32 1.442695, %v799_v32  ;;  %v800_v36 = vmul.f32 -1.702, %v554_v33 }
 0x3f3   :  { %1011 = vpow2.f32 %v561_v35  ;;  %v563_v37 = vmul.f32 1.442695, %v800_v36 }
 0x3f5   :  { %1013 = vpow2.f32 %v563_v37 }
 0x3fd   :  { %v1012_v38 = vpop.eup %1011 }
 0x3fe   :  { %v565_v1 = vadd.f32 1.0, %v1012_v38 }
 0x3ff   :  { %v1014_v39 = vpop.eup %1013 }
 0x400   :  { %1015 = vrcp.f32 %v565_v1  ;;  %v566_v40 = vadd.f32 1.0, %v1014_v39 }
 0x402   :  { %1017 = vrcp.f32 %v566_v40 }
 0x40a   :  { %v1016_v41 = vpop.eup %1015 }
 0x40b   :  { %v571_v42 = vmul.f32 %v1016_v41, %v551_v29 }
 0x40c   :  { %v1018_v43 = vpop.eup %1017 }
 0x40d   :  { %v572_v44 = vmul.f32 %v1018_v43, %v554_v33  ;;  %v573_v45 = vadd.f32 %v571_v42, %v1295_v14 }
 0x40f   :  { %v574_v46 = vadd.f32 %v572_v44, %v1298_v15  ;;  %v579_v23 = vmul.f32 %v578_v10, %v573_v45 }
 0x411   :  { %v585_v49 = vpack.c.bf16 %v574_v46, %v573_v45  ;;  %v580_v48 = vmul.f32 %v578_v10, %v574_v46  ;;  %v581_v27 = vadd.f32 %v579_v23, %v438_v25 }
 0x413   :  { %948 = vmatmul.mubr.bf16.vlgmr.msra.gmra.mrb[8].mxu0 %v585_v49  ;;  %v582_v17 = vadd.f32 %v580_v48, %v439_v26 }
 0x4e6   :  { %v693_v51 = vpop.f32.mrb[8].mxu0 }
 0x4e7   :  { %v694_v52 = vadd.f32 %v803_v50, %v693_v51  ;;  %v949_v53 = vpop.f32.mrb[9].mxu0 }
 0x4e8   :  { %v696_v54 = vpop.f32.mrb[10].mxu0 }
 0x4e9   :  { %v812_v55 = vmul.f32 -1.702, %v694_v52  ;;  %v697_v56 = vadd.f32 %v803_v50, %v696_v54  ;;  %v950_v57 = vpop.f32.mrb[11].mxu0 }
 0x4eb   :  { %v704_v58 = vmul.f32 1.442695, %v812_v55  ;;  %v813_v59 = vmul.f32 -1.702, %v697_v56 }
 0x4ed   :  { %1019 = vpow2.f32 %v704_v58  ;;  %v706_v60 = vmul.f32 1.442695, %v813_v59 }
 0x4ef   :  { %1021 = vpow2.f32 %v706_v60 }
 0x4f7   :  { %v1020_v61 = vpop.eup %1019 }
 0x4f8   :  { %v708_v62 = vadd.f32 1.0, %v1020_v61 }
 0x4f9   :  { %v1022_v63 = vpop.eup %1021 }
 0x4fa   :  { %1023 = vrcp.f32 %v708_v62  ;;  %v709_v0 = vadd.f32 1.0, %v1022_v63 }
 0x4fc   :  { %1025 = vrcp.f32 %v709_v0 }
 0x504   :  { %v1024_v7 = vpop.eup %1023 }
 0x505   :  { %v714_v11 = vmul.f32 %v1024_v7, %v694_v52 }
 0x506   :  { %v1026_v18 = vpop.eup %1025 }
 0x507   :  { %v716_v22 = vadd.f32 %v714_v11, %v573_v45  ;;  %v715_v47 = vmul.f32 %v1026_v18, %v697_v56 }
 0x509   :  { %v717_v24 = vadd.f32 %v715_v47, %v574_v46  ;;  %v722_v16 = vmul.f32 %v721_v21, %v716_v22 }
 0x50b   :  { %v723_v28 = vmul.f32 %v721_v21, %v717_v24  ;;  %v724_v14 = vadd.f32 %v722_v16, %v581_v27 }
 0x50d   :  { %v725_v29 = vadd.f32 %v723_v28, %v582_v17 }
 0x50f   :  { %v822_v15 = vpack.c.bf16 %v725_v29, %v724_v14 }
 0x511   :  { %823 = vst [vmem:[#allocation11] sm:$0xff] %v822_v15  }
 0x512   :  { %1114 = shalt.err (!%p1111_p3)
}
 0x513   :  { %s1115_s14 = scalar_lea.hbm %s1344_s6, 128 }
 0x514   :  { %p1116_p4 = scmp.ne.s32.totalorder %s1344_s6, %s1115_s14  ;;  %p1119_p5 = scmp.lt.u32.totalorder %s1115_s14, %s1344_s6 }
 0x516   :  { %p1121_p6 = pnand %p1119_p5, %p1116_p4 }
 0x518   :  { %1124 = shalt.err (!%p1121_p6)
}
 0x519   :  { %751 = dma.vmem_to_hbm [thread:$0]  %s746_s8, 128, %s1344_s6, [#allocation5], %s1135_s9, %s1135_s9, %s1136_s10  }
 0x51a   :  { %1131 = dma.done.wait [#allocation5], 128  }
 0x51b   :  { %1132 = vsyncadd [#allocation5], 4294967168 }
 0x51c   :  { %755 = vsyncpa [#allocation4], 1 }
 0x51d   :  { %756 = vsyncpa [#allocation9], 1 }
 0x51e   :  { %757 = vsyncpa [#allocation5], 1 }
 0x51f   :  { %758 = vsyncpa [#allocation6], 1 }

</bundles_post_ra>
